<compile_context>
chip_gen: v7x
topology: tpu7x:2x2x1
jax: 0.10.0
libtpu: 0.0.40
codegen_flags: <defaults>
</compile_context>

<pallas_src>
import jax
import jax.numpy as jnp
import numpy as np
from jax import lax
from jax.experimental import pallas as pl
from jax.experimental.pallas import tpu as pltpu


# ----------------------------------------------------------------------------
# Parameter construction (deterministic, synthetic -- no checkpoint loading).
# BatchNorm (eval mode) folded into the conv:  y = (xW + b)*s + t
#   ->  W' = W*s (per output column),  b' = b*s + t.
# Weights stored bf16 (MXU-native), biases stay f32.
# ----------------------------------------------------------------------------
def init_mlp_params(key, channels, zero_last_bias):
    """Returns a flat list [W1, b1, W2, b2, ...] with BN folded in."""
    params = []
    n = len(channels)
    for i in range(1, n):
        cin, cout = channels[i - 1], channels[i]
        key, k1, k2, k3, k4, k5, k6 = jax.random.split(key, 7)
        bound = 1.0 / np.sqrt(cin)
        w = jax.random.uniform(k1, (cin, cout), jnp.float32, -bound, bound)
        if i == n - 1 and zero_last_bias:
            b = jnp.zeros((1, cout), jnp.float32)  # nn.init.constant_(bias, 0.0)
        else:
            b = jax.random.uniform(k2, (1, cout), jnp.float32, -bound, bound)
        if i < n - 1:
            # eval-mode BatchNorm1d folded into the conv weights/bias
            gamma = 1.0 + 0.1 * jax.random.normal(k3, (1, cout), jnp.float32)
            beta = 0.1 * jax.random.normal(k4, (1, cout), jnp.float32)
            mean = 0.1 * jax.random.normal(k5, (1, cout), jnp.float32)
            var = jnp.abs(jax.random.normal(k6, (1, cout), jnp.float32)) + 0.5
            scale = gamma / jnp.sqrt(var + 1e-5)
            shift = beta - mean * scale
            w = w * scale
            b = b * scale + shift
        params += [w.astype(jnp.bfloat16), b.astype(jnp.float32)]
    return params, key


def _choose_tile(n, f):
    """Largest lane-dense N-tile that divides N.

    Bigger tiles amortize the ~0.35 us per-grid-step overhead and enlarge the
    MXU M dimension; per-tile working set stays a few MiB even at F=256.
    """
    cap = 2048 if f <= 128 else 1024
    for t in (2048, 1024, 512, 256, 128):
        if t <= cap and n % t == 0:
            return t
    return n  # small / odd N: one full-extent tile (masked stores; perf cliff)


def _fused_vmem_estimate(N, TN, F, cin, weights):
    """Rough VMEM footprint of the fused path (resident desc + tile buffers)."""
    lane = 128
    f_pad = -(-F // lane) * lane
    desc_scratch = N * f_pad * 2                        # bf16, lane-padded
    io_blocks = 2 * TN * cin * 4 + 2 * f_pad * TN * 4   # double-buffered kpts/out
    w_bytes = 2 * sum(int(np.prod(w.shape)) * jnp.dtype(w.dtype).itemsize
                      for w in weights)
    misc = 4 * 3 * f_pad + (1 << 16)
    return desc_scratch + io_blocks + w_bytes + misc


_FUSED_SCRATCH_BUDGET = 24 << 20   # conservative vs v7x 64 MiB physical VMEM
_VMEM_LIMIT_BYTES = 32 << 20       # v5e default scoped VMEM is only 16 MiB


# ----------------------------------------------------------------------------
# Fused kernel: grid = (B, 2, n_tiles).
#   phase 0: encoder1 per tile -> desc scratch (VMEM resident) + running gmax
#   phase 1: encoder2 per tile from scratch, (F, TN) channels-first stores
# ----------------------------------------------------------------------------
def make_fused_kernel(n_enc1):
    n_p1 = 2 * n_enc1

    def kernel(x_ref, *refs):
        p1 = refs[:n_p1]
        wt_ref, wb_ref, b1_ref, w2_ref, b2_ref = refs[n_p1:n_p1 + 5]
        out_ref = refs[n_p1 + 5]
        desc_sc, gmax_sc, rb_sc = refs[n_p1 + 6:]

        ph = pl.program_id(1)
        t = pl.program_id(2)

        @pl.when(ph == 0)
        def _encoder1():
            h = x_ref[0]                                        # (TN, 33) f32
            for li in range(n_enc1):
                w = p1[2 * li][...]                             # bf16 (Cin, Cout)
                b = p1[2 * li + 1][...]                         # f32  (1, Cout)
                h = jnp.dot(h.astype(jnp.bfloat16), w,
                            preferred_element_type=jnp.float32) + b
                if li < n_enc1 - 1:                             # BN folded: ReLU only
                    h = jnp.maximum(h, 0.0).astype(jnp.bfloat16)
            desc_sc[t] = h.astype(jnp.bfloat16)                 # VMEM-resident desc
            tile_max = jnp.max(h, axis=0, keepdims=True)        # (1, F) f32

            @pl.when(t == 0)
            def _():
                gmax_sc[...] = tile_max

            @pl.when(t > 0)
            def _():
                gmax_sc[...] = jnp.maximum(gmax_sc[...], tile_max)

        @pl.when(ph == 1)
        def _encoder2():
            @pl.when(t == 0)
            def _():
                # row_bias = gmax @ W_bot + b1 -- once per batch element.
                rb_sc[...] = jnp.dot(gmax_sc[...].astype(jnp.bfloat16),
                                     wb_ref[...],
                                     preferred_element_type=jnp.float32) + b1_ref[...]

            h = jnp.dot(desc_sc[t], wt_ref[...],
                        preferred_element_type=jnp.float32) + rb_sc[...]   # (TN, 2F)
            h = jnp.maximum(h, 0.0).astype(jnp.bfloat16)
            # (F, TN) straight off the MXU: contract W2 dim 0 with h dim 1 --
            # no explicit (TN, F) -> (F, TN) transpose in the kernel.
            out = lax.dot_general(w2_ref[...], h,
                                  dimension_numbers=(((0,), (1,)), ((), ())),
                                  preferred_element_type=jnp.float32)
            out_ref[0] = (out + b2_ref[...]).astype(out_ref.dtype)

    return kernel


# ----------------------------------------------------------------------------
# Fallback pass 1: encoder1 per tile + running global max -> HBM outputs.
# ----------------------------------------------------------------------------
def make_enc1_kernel(n_enc1):
    def kernel(x_ref, *refs):
        desc_ref, gmax_ref = refs[-2], refs[-1]
        p = refs[:-2]

        h = x_ref[0]                                            # (TN, 33) f32
        for li in range(n_enc1):
            h = jnp.dot(h.astype(jnp.bfloat16), p[2 * li][...],
                        preferred_element_type=jnp.float32) + p[2 * li + 1][...]
            if li < n_enc1 - 1:
                h = jnp.maximum(h, 0.0).astype(jnp.bfloat16)

        desc_ref[0] = h.astype(desc_ref.dtype)                  # bf16 intermediate
        tile_max = jnp.max(h, axis=0, keepdims=True)            # (1, F)
        t = pl.program_id(1)

        @pl.when(t == 0)
        def _():
            gmax_ref[0] = tile_max

        @pl.when(t > 0)
        def _():
            gmax_ref[0] = jnp.maximum(gmax_ref[0], tile_max)

    return kernel


# ----------------------------------------------------------------------------
# Fallback pass 2: encoder2 per tile, row_bias precomputed in the wrapper,
# channels-first (F, TN) output without an in-kernel transpose.
# ----------------------------------------------------------------------------
def enc2_tile_kernel(desc_ref, rb_ref, wt_ref, w2_ref, b2_ref, out_ref):
    h = jnp.dot(desc_ref[0], wt_ref[...],
                preferred_element_type=jnp.float32) + rb_ref[0]            # (TN, 2F)
    h = jnp.maximum(h, 0.0).astype(jnp.bfloat16)
    out = lax.dot_general(w2_ref[...], h,
                          dimension_numbers=(((0,), (1,)), ((), ())),
                          preferred_element_type=jnp.float32)              # (F, TN)
    out_ref[0] = (out + b2_ref[...]).astype(out_ref.dtype)


# ----------------------------------------------------------------------------
# Wrapper.  Returns (B, F, N), matching the PyTorch output layout.
# ----------------------------------------------------------------------------
def descriptor_global_encoder(kpts, enc1_params, enc2_params, feature_dim,
                              tile_n=None, force_two_pass=False):
    B, N, cin = kpts.shape
    F = feature_dim
    TN = tile_n if tile_n is not None else _choose_tile(N, F)
    assert N % TN == 0, (N, TN)
    n_tiles = N // TN
    n_enc1 = len(enc1_params) // 2

    # Split encoder2's first conv:  cat([desc, gloab], C) @ W1
    #   == desc @ W1[:F] + broadcast(gmax @ W1[F:]).
    w1, b1, w2, b2 = enc2_params
    w_top, w_bot = w1[:F, :], w1[F:, :]
    b2_t = b2.reshape(F, 1)     # pre-shaped so the (F, TN) result adds directly
    enc2_flat = [w_top, w_bot, b1, w2, b2_t]

    const2 = lambda b, t: (0, 0)        # constant weights: block never changes
    const3 = lambda b, ph, t: (0, 0)

    est = _fused_vmem_estimate(N, TN, F, cin, list(enc1_params) + enc2_flat)
    use_fused = (not force_two_pass) and est <= _FUSED_SCRATCH_BUDGET

    if use_fused:
        def x_map(b, ph, t):
            # Phase 1 pins the block to the last phase-0 tile -> no re-fetch.
            return (b, t * (1 - ph) + (n_tiles - 1) * ph, 0)

        def out_map(b, ph, t):
            # Phase 0 never writes; pin the index so no garbage block is flushed.
            return (b, 0, t * ph)

        return pl.pallas_call(
            make_fused_kernel(n_enc1),
            out_shape=jax.ShapeDtypeStruct((B, F, N), kpts.dtype),
            grid=(B, 2, n_tiles),
            in_specs=[pl.BlockSpec((1, TN, cin), x_map)]
                     + [pl.BlockSpec(p.shape, const3) for p in enc1_params]
                     + [pl.BlockSpec(p.shape, const3) for p in enc2_flat],
            out_specs=pl.BlockSpec((1, F, TN), out_map),
            scratch_shapes=[pltpu.VMEM((n_tiles, TN, F), jnp.bfloat16),
                            pltpu.VMEM((1, F), jnp.float32),
                            pltpu.VMEM((1, 2 * F), jnp.float32)],
            compiler_params=pltpu.CompilerParams(
                dimension_semantics=("parallel", "arbitrary", "arbitrary"),
                vmem_limit_bytes=_VMEM_LIMIT_BYTES),
        )(kpts, *enc1_params, *enc2_flat)

    # ---- fallback: two passes with a bf16 desc round trip through HBM ----
    desc, gmax = pl.pallas_call(
        make_enc1_kernel(n_enc1),
        out_shape=(jax.ShapeDtypeStruct((B, N, F), jnp.bfloat16),
                   jax.ShapeDtypeStruct((B, 1, F), jnp.float32)),
        grid=(B, n_tiles),
        in_specs=[pl.BlockSpec((1, TN, cin), lambda b, t: (b, t, 0))]
                 + [pl.BlockSpec(p.shape, const2) for p in enc1_params],
        out_specs=(pl.BlockSpec((1, TN, F), lambda b, t: (b, t, 0)),
                   pl.BlockSpec((1, 1, F), lambda b, t: (b, 0, 0))),
        compiler_params=pltpu.CompilerParams(
            dimension_semantics=("parallel", "arbitrary"),
            vmem_limit_bytes=_VMEM_LIMIT_BYTES),
    )(kpts, *enc1_params)

    # row_bias hoisted out of the per-tile kernel: one tiny matmul per batch.
    row_bias = lax.dot_general(gmax.astype(jnp.bfloat16), w_bot,
                               (((2,), (0,)), ((), ())),
                               preferred_element_type=jnp.float32) + b1   # (B,1,2F)

    return pl.pallas_call(
        enc2_tile_kernel,
        out_shape=jax.ShapeDtypeStruct((B, F, N), kpts.dtype),
        grid=(B, n_tiles),
        in_specs=[pl.BlockSpec((1, TN, F), lambda b, t: (b, t, 0)),
                  pl.BlockSpec((1, 1, 2 * F), lambda b, t: (b, 0, 0)),
                  pl.BlockSpec(w_top.shape, const2),
                  pl.BlockSpec(w2.shape, const2),
                  pl.BlockSpec(b2_t.shape, const2)],
        out_specs=pl.BlockSpec((1, F, TN), lambda b, t: (b, 0, t)),
        compiler_params=pltpu.CompilerParams(
            dimension_semantics=("parallel", "parallel"),
            vmem_limit_bytes=_VMEM_LIMIT_BYTES),
    )(desc, row_bias, w_top, w2, b2_t)


# ----------------------------------------------------------------------------
# Pure-JAX reference (same math/precision, concat form) for correctness check.
# ----------------------------------------------------------------------------
def ref_forward(kpts, enc1_params, enc2_params):
    def run_mlp(h, params):
        nl = len(params) // 2
        for li in range(nl):
            w, b = params[2 * li], params[2 * li + 1]
            h = jnp.einsum("bnc,cd->bnd", h.astype(jnp.bfloat16), w,
                           preferred_element_type=jnp.float32) + b
            if li < nl - 1:
                h = jnp.maximum(h, 0.0)
        return h

    desc = run_mlp(kpts.astype(jnp.float32), enc1_params)      # (B, N, F)
    gmax = jnp.max(desc, axis=1, keepdims=True)                # (B, 1, F)
    gloab = jnp.broadcast_to(gmax, desc.shape)
    out = run_mlp(jnp.concatenate([desc, gloab], axis=2), enc2_params)
    return jnp.transpose(out, (0, 2, 1))                       # (B, F, N)


if __name__ == "__main__":
    # Small config: DescriptorGloabalEncoder(feature_dim=32, layers=[32])
    B, N = 2, 512
    feature_dim = 32
    layers = [32]
    enc1_channels = [33] + layers + [feature_dim]                    # [33, 32, 32]
    enc2_channels = [feature_dim * 2, feature_dim * 2, feature_dim]  # [64, 64, 32]

    key = jax.random.PRNGKey(0)
    enc1_params, key = init_mlp_params(key, enc1_channels, zero_last_bias=True)
    enc2_params, key = init_mlp_params(key, enc2_channels, zero_last_bias=True)

    key, kx = jax.random.split(key)
    kpts = jax.random.normal(kx, (B, N, 33), jnp.float32)

    ref = jax.block_until_ready(ref_forward(kpts, enc1_params, enc2_params))

    # Fused single-call path, tile_n=128 -> 4 N-tiles: exercises the running
    # global max and the VMEM-resident desc scratch across phase/tile axes.
    out = descriptor_global_encoder(kpts, enc1_params, enc2_params,
                                    feature_dim, tile_n=128)
    out = jax.block_until_ready(out)
    assert out.shape == (B, feature_dim, N), out.shape
    np.testing.assert_allclose(np.asarray(out), np.asarray(ref),
                               rtol=1e-2, atol=1e-2)

    # Two-pass fallback path (taken automatically when the resident desc
    # scratch would not fit the VMEM budget, e.g. very large N*F on v7x).
    out2 = descriptor_global_encoder(kpts, enc1_params, enc2_params,
                                     feature_dim, tile_n=128,
                                     force_two_pass=True)
    out2 = jax.block_until_ready(out2)
    np.testing.assert_allclose(np.asarray(out2), np.asarray(ref),
                               rtol=1e-2, atol=1e-2)

    print("KERNEL_OK")
</pallas_src>

<mosaic_0001>
module attributes {stable_mosaic.version = 11 : i64} {
  func.func @kernel(%arg0: i32, %arg1: i32, %arg2: i32, %arg3: memref<1x128x33xf32, #tpu.memory_space<vmem>>, %arg4: memref<33x32xbf16, #tpu.memory_space<vmem>>, %arg5: memref<1x32xf32, #tpu.memory_space<vmem>>, %arg6: memref<32x32xbf16, #tpu.memory_space<vmem>>, %arg7: memref<1x32xf32, #tpu.memory_space<vmem>>, %arg8: memref<32x64xbf16, #tpu.memory_space<vmem>>, %arg9: memref<32x64xbf16, #tpu.memory_space<vmem>>, %arg10: memref<1x64xf32, #tpu.memory_space<vmem>>, %arg11: memref<64x32xbf16, #tpu.memory_space<vmem>>, %arg12: memref<32x1xf32, #tpu.memory_space<vmem>>, %arg13: memref<1x32x128xf32, #tpu.memory_space<vmem>>, %arg14: memref<4x128x32xbf16, #tpu.memory_space<vmem>>, %arg15: memref<1x32xf32, #tpu.memory_space<vmem>>, %arg16: memref<1x64xf32, #tpu.memory_space<vmem>>) attributes {dimension_semantics = [#tpu.dimension_semantics<parallel>, #tpu.dimension_semantics<arbitrary>, #tpu.dimension_semantics<arbitrary>], iteration_bounds = array<i64: 2, 2, 4>, scalar_prefetch = 0 : i64, scratch_operands = 3 : i64, tpu.core_type = #tpu.core_type<tc>, window_params = [{transform_indices = @transform_0, window_bounds = array<i64: 1, 128, 33>}, {pipeline_mode = #tpu.pipeline_mode<synchronous>, transform_indices = @transform_1, window_bounds = array<i64: 33, 32>}, {pipeline_mode = #tpu.pipeline_mode<synchronous>, transform_indices = @transform_2, window_bounds = array<i64: 1, 32>}, {pipeline_mode = #tpu.pipeline_mode<synchronous>, transform_indices = @transform_3, window_bounds = array<i64: 32, 32>}, {pipeline_mode = #tpu.pipeline_mode<synchronous>, transform_indices = @transform_4, window_bounds = array<i64: 1, 32>}, {pipeline_mode = #tpu.pipeline_mode<synchronous>, transform_indices = @transform_5, window_bounds = array<i64: 32, 64>}, {pipeline_mode = #tpu.pipeline_mode<synchronous>, transform_indices = @transform_6, window_bounds = array<i64: 32, 64>}, {pipeline_mode = #tpu.pipeline_mode<synchronous>, transform_indices = @transform_7, window_bounds = array<i64: 1, 64>}, {pipeline_mode = #tpu.pipeline_mode<synchronous>, transform_indices = @transform_8, window_bounds = array<i64: 64, 32>}, {pipeline_mode = #tpu.pipeline_mode<synchronous>, transform_indices = @transform_9, window_bounds = array<i64: 32, 1>}, {transform_indices = @transform_10, window_bounds = array<i64: 1, 32, 128>}]} {
    %c0_i32 = arith.constant 0 : i32
    %0 = arith.cmpi eq, %arg1, %c0_i32 : i32
    %1 = arith.extui %0 : i1 to i32
    %c0_i32_0 = arith.constant 0 : i32
    %2 = arith.cmpi ne, %1, %c0_i32_0 : i32
    scf.if %2 {
      %c0 = arith.constant 0 : index
      %c0_2 = arith.constant 0 : index
      %c0_3 = arith.constant 0 : index
      %6 = vector.load %arg3[%c0, %c0_2, %c0_3] : memref<1x128x33xf32, #tpu.memory_space<vmem>>, vector<1x128x33xf32>
      %7 = vector.shape_cast %6 : vector<1x128x33xf32> to vector<128x33xf32>
      %c0_4 = arith.constant 0 : index
      %c0_5 = arith.constant 0 : index
      %8 = vector.load %arg4[%c0_4, %c0_5] : memref<33x32xbf16, #tpu.memory_space<vmem>>, vector<33x32xbf16>
      %c0_6 = arith.constant 0 : index
      %c0_7 = arith.constant 0 : index
      %9 = vector.load %arg5[%c0_6, %c0_7] : memref<1x32xf32, #tpu.memory_space<vmem>>, vector<1x32xf32>
      %10 = arith.truncf %7 : vector<128x33xf32> to vector<128x33xbf16>
      %cst = arith.constant dense<0.000000e+00> : vector<128x32xf32>
      %11 = tpu.matmul %10, %8, %cst {dimension_numbers = #tpu.dot_dimension_numbers<[1], [0], [0], [1], [0, 0, 1, 1], [], []>} : vector<128x33xbf16>, vector<33x32xbf16>, vector<128x32xf32> -> vector<128x32xf32>
      %12 = vector.broadcast %9 : vector<1x32xf32> to vector<128x32xf32>
      %13 = arith.addf %11, %12 : vector<128x32xf32>
      %cst_8 = arith.constant 0.000000e+00 : f32
      %14 = vector.broadcast %cst_8 : f32 to vector<128x32xf32>
      %15 = arith.maximumf %13, %14 : vector<128x32xf32>
      %16 = arith.truncf %15 : vector<128x32xf32> to vector<128x32xbf16>
      %c0_9 = arith.constant 0 : index
      %c0_10 = arith.constant 0 : index
      %17 = vector.load %arg6[%c0_9, %c0_10] : memref<32x32xbf16, #tpu.memory_space<vmem>>, vector<32x32xbf16>
      %c0_11 = arith.constant 0 : index
      %c0_12 = arith.constant 0 : index
      %18 = vector.load %arg7[%c0_11, %c0_12] : memref<1x32xf32, #tpu.memory_space<vmem>>, vector<1x32xf32>
      %cst_13 = arith.constant dense<0.000000e+00> : vector<128x32xf32>
      %19 = tpu.matmul %16, %17, %cst_13 {dimension_numbers = #tpu.dot_dimension_numbers<[1], [0], [0], [1], [0, 0, 1, 1], [], []>} : vector<128x32xbf16>, vector<32x32xbf16>, vector<128x32xf32> -> vector<128x32xf32>
      %20 = vector.broadcast %18 : vector<1x32xf32> to vector<128x32xf32>
      %21 = arith.addf %19, %20 : vector<128x32xf32>
      %22 = arith.truncf %21 : vector<128x32xf32> to vector<128x32xbf16>
      %23 = arith.index_cast %arg2 : i32 to index
      %c0_14 = arith.constant 0 : index
      %c0_15 = arith.constant 0 : index
      %24 = vector.load %arg14[%23, %c0_14, %c0_15] : memref<4x128x32xbf16, #tpu.memory_space<vmem>>, vector<1x128x32xbf16>
      %25 = vector.shape_cast %24 : vector<1x128x32xbf16> to vector<128x32xbf16>
      %26 = vector.shape_cast %22 : vector<128x32xbf16> to vector<1x128x32xbf16>
      tpu.vector_store %arg14[%23, %c0_14, %c0_15], %26 {strides = array<i32>} : memref<4x128x32xbf16, #tpu.memory_space<vmem>>, vector<1x128x32xbf16>,
      %cst_16 = arith.constant dense<0xFF800000> : vector<32xf32>
      %27 = vector.multi_reduction <maximumf>, %21, %cst_16 [0] : vector<128x32xf32> to vector<32xf32>
      %28 = vector.shape_cast %27 : vector<32xf32> to vector<1x32xf32>
      %c0_i32_17 = arith.constant 0 : i32
      %29 = arith.cmpi eq, %arg2, %c0_i32_17 : i32
      %30 = arith.extui %29 : i1 to i32
      %c0_i32_18 = arith.constant 0 : i32
      %31 = arith.cmpi ne, %30, %c0_i32_18 : i32
      scf.if %31 {
        %c0_21 = arith.constant 0 : index
        %c0_22 = arith.constant 0 : index
        %35 = vector.load %arg15[%c0_21, %c0_22] : memref<1x32xf32, #tpu.memory_space<vmem>>, vector<1x32xf32>
        tpu.vector_store %arg15[%c0_21, %c0_22], %28 {strides = array<i32>} : memref<1x32xf32, #tpu.memory_space<vmem>>, vector<1x32xf32>,
      } else {
      }
      %c0_i32_19 = arith.constant 0 : i32
      %32 = arith.cmpi sgt, %arg2, %c0_i32_19 : i32
      %33 = arith.extui %32 : i1 to i32
      %c0_i32_20 = arith.constant 0 : i32
      %34 = arith.cmpi ne, %33, %c0_i32_20 : i32
      scf.if %34 {
        %c0_21 = arith.constant 0 : index
        %c0_22 = arith.constant 0 : index
        %35 = vector.load %arg15[%c0_21, %c0_22] : memref<1x32xf32, #tpu.memory_space<vmem>>, vector<1x32xf32>
        %36 = arith.maximumf %35, %28 : vector<1x32xf32>
        %c0_23 = arith.constant 0 : index
        %c0_24 = arith.constant 0 : index
        %37 = vector.load %arg15[%c0_23, %c0_24] : memref<1x32xf32, #tpu.memory_space<vmem>>, vector<1x32xf32>
        tpu.vector_store %arg15[%c0_23, %c0_24], %36 {strides = array<i32>} : memref<1x32xf32, #tpu.memory_space<vmem>>, vector<1x32xf32>,
      } else {
      }
    } else {
    }
    %c1_i32 = arith.constant 1 : i32
    %3 = arith.cmpi eq, %arg1, %c1_i32 : i32
    %4 = arith.extui %3 : i1 to i32
    %c0_i32_1 = arith.constant 0 : i32
    %5 = arith.cmpi ne, %4, %c0_i32_1 : i32
    scf.if %5 {
      %c0_i32_2 = arith.constant 0 : i32
      %6 = arith.cmpi eq, %arg2, %c0_i32_2 : i32
      %7 = arith.extui %6 : i1 to i32
      %c0_i32_3 = arith.constant 0 : i32
      %8 = arith.cmpi ne, %7, %c0_i32_3 : i32
      scf.if %8 {
        %c0_18 = arith.constant 0 : index
        %c0_19 = arith.constant 0 : index
        %28 = vector.load %arg15[%c0_18, %c0_19] : memref<1x32xf32, #tpu.memory_space<vmem>>, vector<1x32xf32>
        %29 = arith.truncf %28 : vector<1x32xf32> to vector<1x32xbf16>
        %c0_20 = arith.constant 0 : index
        %c0_21 = arith.constant 0 : index
        %30 = vector.load %arg9[%c0_20, %c0_21] : memref<32x64xbf16, #tpu.memory_space<vmem>>, vector<32x64xbf16>
        %cst_22 = arith.constant dense<0.000000e+00> : vector<1x64xf32>
        %31 = tpu.matmul %29, %30, %cst_22 {dimension_numbers = #tpu.dot_dimension_numbers<[1], [0], [0], [1], [0, 0, 1, 1], [], []>} : vector<1x32xbf16>, vector<32x64xbf16>, vector<1x64xf32> -> vector<1x64xf32>
        %c0_23 = arith.constant 0 : index
        %c0_24 = arith.constant 0 : index
        %32 = vector.load %arg10[%c0_23, %c0_24] : memref<1x64xf32, #tpu.memory_space<vmem>>, vector<1x64xf32>
        %33 = arith.addf %31, %32 : vector<1x64xf32>
        %c0_25 = arith.constant 0 : index
        %c0_26 = arith.constant 0 : index
        %34 = vector.load %arg16[%c0_25, %c0_26] : memref<1x64xf32, #tpu.memory_space<vmem>>, vector<1x64xf32>
        tpu.vector_store %arg16[%c0_25, %c0_26], %33 {strides = array<i32>} : memref<1x64xf32, #tpu.memory_space<vmem>>, vector<1x64xf32>,
      } else {
      }
      %9 = arith.index_cast %arg2 : i32 to index
      %c0 = arith.constant 0 : index
      %c0_4 = arith.constant 0 : index
      %10 = vector.load %arg14[%9, %c0, %c0_4] : memref<4x128x32xbf16, #tpu.memory_space<vmem>>, vector<1x128x32xbf16>
      %11 = vector.shape_cast %10 : vector<1x128x32xbf16> to vector<128x32xbf16>
      %c0_5 = arith.constant 0 : index
      %c0_6 = arith.constant 0 : index
      %12 = vector.load %arg8[%c0_5, %c0_6] : memref<32x64xbf16, #tpu.memory_space<vmem>>, vector<32x64xbf16>
      %cst = arith.constant dense<0.000000e+00> : vector<128x64xf32>
      %13 = tpu.matmul %11, %12, %cst {dimension_numbers = #tpu.dot_dimension_numbers<[1], [0], [0], [1], [0, 0, 1, 1], [], []>} : vector<128x32xbf16>, vector<32x64xbf16>, vector<128x64xf32> -> vector<128x64xf32>
      %c0_7 = arith.constant 0 : index
      %c0_8 = arith.constant 0 : index
      %14 = vector.load %arg16[%c0_7, %c0_8] : memref<1x64xf32, #tpu.memory_space<vmem>>, vector<1x64xf32>
      %15 = vector.broadcast %14 : vector<1x64xf32> to vector<128x64xf32>
      %16 = arith.addf %13, %15 : vector<128x64xf32>
      %cst_9 = arith.constant 0.000000e+00 : f32
      %17 = vector.broadcast %cst_9 : f32 to vector<128x64xf32>
      %18 = arith.maximumf %16, %17 : vector<128x64xf32>
      %19 = arith.truncf %18 : vector<128x64xf32> to vector<128x64xbf16>
      %c0_10 = arith.constant 0 : index
      %c0_11 = arith.constant 0 : index
      %20 = vector.load %arg11[%c0_10, %c0_11] : memref<64x32xbf16, #tpu.memory_space<vmem>>, vector<64x32xbf16>
      %cst_12 = arith.constant dense<0.000000e+00> : vector<32x128xf32>
      %21 = tpu.matmul %20, %19, %cst_12 {dimension_numbers = #tpu.dot_dimension_numbers<[0], [1], [1], [0], [0, 1, 1, 0], [], []>} : vector<64x32xbf16>, vector<128x64xbf16>, vector<32x128xf32> -> vector<32x128xf32>
      %c0_13 = arith.constant 0 : index
      %c0_14 = arith.constant 0 : index
      %22 = vector.load %arg12[%c0_13, %c0_14] : memref<32x1xf32, #tpu.memory_space<vmem>>, vector<32x1xf32>
      %23 = vector.broadcast %22 : vector<32x1xf32> to vector<32x128xf32>
      %24 = arith.addf %21, %23 : vector<32x128xf32>
      %c0_15 = arith.constant 0 : index
      %c0_16 = arith.constant 0 : index
      %c0_17 = arith.constant 0 : index
      %25 = vector.load %arg13[%c0_15, %c0_16, %c0_17] : memref<1x32x128xf32, #tpu.memory_space<vmem>>, vector<1x32x128xf32>
      %26 = vector.shape_cast %25 : vector<1x32x128xf32> to vector<32x128xf32>
      %27 = vector.shape_cast %24 : vector<32x128xf32> to vector<1x32x128xf32>
      tpu.vector_store %arg13[%c0_15, %c0_16, %c0_17], %27 {strides = array<i32>} : memref<1x32x128xf32, #tpu.memory_space<vmem>>, vector<1x32x128xf32>,
    } else {
    }
    return
  }
  func.func @transform_0(%arg0: i32, %arg1: i32, %arg2: i32) -> (i32, i32, i32) {
    %c1_i32 = arith.constant 1 : i32
    %0 = arith.subi %c1_i32, %arg1 : i32
    %1 = arith.muli %arg2, %0 : i32
    %c3_i32 = arith.constant 3 : i32
    %2 = arith.muli %c3_i32, %arg1 : i32
    %3 = arith.addi %1, %2 : i32
    %c0_i32 = arith.constant 0 : i32
    %c0_i32_0 = arith.constant 0 : i32
    return %arg0, %3, %c0_i32 : i32, i32, i32
  }
  func.func @transform_1(%arg0: i32, %arg1: i32, %arg2: i32) -> (i32, i32) {
    %c0_i32 = arith.constant 0 : i32
    %c0_i32_0 = arith.constant 0 : i32
    %c0_i32_1 = arith.constant 0 : i32
    return %c0_i32, %c0_i32_0 : i32, i32
  }
  func.func @transform_2(%arg0: i32, %arg1: i32, %arg2: i32) -> (i32, i32) {
    %c0_i32 = arith.constant 0 : i32
    %c0_i32_0 = arith.constant 0 : i32
    %c0_i32_1 = arith.constant 0 : i32
    return %c0_i32, %c0_i32_0 : i32, i32
  }
  func.func @transform_3(%arg0: i32, %arg1: i32, %arg2: i32) -> (i32, i32) {
    %c0_i32 = arith.constant 0 : i32
    %c0_i32_0 = arith.constant 0 : i32
    %c0_i32_1 = arith.constant 0 : i32
    return %c0_i32, %c0_i32_0 : i32, i32
  }
  func.func @transform_4(%arg0: i32, %arg1: i32, %arg2: i32) -> (i32, i32) {
    %c0_i32 = arith.constant 0 : i32
    %c0_i32_0 = arith.constant 0 : i32
    %c0_i32_1 = arith.constant 0 : i32
    return %c0_i32, %c0_i32_0 : i32, i32
  }
  func.func @transform_5(%arg0: i32, %arg1: i32, %arg2: i32) -> (i32, i32) {
    %c0_i32 = arith.constant 0 : i32
    %c0_i32_0 = arith.constant 0 : i32
    %c0_i32_1 = arith.constant 0 : i32
    return %c0_i32, %c0_i32_0 : i32, i32
  }
  func.func @transform_6(%arg0: i32, %arg1: i32, %arg2: i32) -> (i32, i32) {
    %c0_i32 = arith.constant 0 : i32
    %c0_i32_0 = arith.constant 0 : i32
    %c0_i32_1 = arith.constant 0 : i32
    return %c0_i32, %c0_i32_0 : i32, i32
  }
  func.func @transform_7(%arg0: i32, %arg1: i32, %arg2: i32) -> (i32, i32) {
    %c0_i32 = arith.constant 0 : i32
    %c0_i32_0 = arith.constant 0 : i32
    %c0_i32_1 = arith.constant 0 : i32
    return %c0_i32, %c0_i32_0 : i32, i32
  }
  func.func @transform_8(%arg0: i32, %arg1: i32, %arg2: i32) -> (i32, i32) {
    %c0_i32 = arith.constant 0 : i32
    %c0_i32_0 = arith.constant 0 : i32
    %c0_i32_1 = arith.constant 0 : i32
    return %c0_i32, %c0_i32_0 : i32, i32
  }
  func.func @transform_9(%arg0: i32, %arg1: i32, %arg2: i32) -> (i32, i32) {
    %c0_i32 = arith.constant 0 : i32
    %c0_i32_0 = arith.constant 0 : i32
    %c0_i32_1 = arith.constant 0 : i32
    return %c0_i32, %c0_i32_0 : i32, i32
  }
  func.func @transform_10(%arg0: i32, %arg1: i32, %arg2: i32) -> (i32, i32, i32) {
    %0 = arith.muli %arg2, %arg1 : i32
    %c0_i32 = arith.constant 0 : i32
    %c0_i32_0 = arith.constant 0 : i32
    return %arg0, %c0_i32, %0 : i32, i32, i32
  }
}

</mosaic_0001>

<bundles_post_ra>
// kernel: tpu_custom_call.1
= control target key start
LH: loop header
LB: loop body
LE: loop exit
PB: predicated region body
PF: predicated region fallthrough
CT: control target
= control target key end

     0   :  { %15 = vsyncpa [#allocation6], 0  ;;  %s2213_s0 = inlined_call_operand.vmem [shape: f32[2,512,33], index: 0, kind: input, shape index: {}]   ;;  %s2214_s1 = inlined_call_operand.vmem [shape: bf16[33,32], index: 1, kind: input, shape index: {}]   ;;  %s2215_s2 = inlined_call_operand.vmem [shape: f32[1,32], index: 2, kind: input, shape index: {}]   ;;  %s2216_s3 = inlined_call_operand.vmem [shape: bf16[32,32], index: 3, kind: input, shape index: {}]   ;;  %s2217_s4 = inlined_call_operand.vmem [shape: f32[1,32], index: 4, kind: input, shape index: {}]   ;;  %s2218_s5 = inlined_call_operand.vmem [shape: bf16[32,64], index: 5, kind: input, shape index: {}]   ;;  %s2219_s6 = inlined_call_operand.vmem [shape: bf16[32,64], index: 6, kind: input, shape index: {}]   ;;  %s2220_s7 = inlined_call_operand.vmem [shape: f32[1,64], index: 7, kind: input, shape index: {}]   ;;  %s2221_s8 = inlined_call_operand.vmem [shape: bf16[64,32], index: 8, kind: input, shape index: {}]   ;;  %s2222_s9 = inlined_call_operand.vmem [shape: f32[32,1], index: 9, kind: input, shape index: {}]   ;;  %s2223_s10 = inlined_call_operand.hbm [shape: f32[2,32,512], index: 10, kind: output, shape index: {}]  }
   0x1   :  { %17 = vsyncpa [#allocation6 + $0x1], 0  ;;  %s1859_s13 = smov 0   ;;  %s1861_s14 = smov 0  }
   0x2   :  { %s1863_s15 = smov 0   ;;  %s1865_s16 = smov 0  }
   0x3   :  { %s1867_s17 = smov 0   ;;  %s1869_s18 = smov 0  }
   0x4   :  { %s1871_s19 = smov 0   ;;  %s1873_s20 = smov 0  }
   0x5   :  { %s1875_s21 = smov 0   ;;  %s1877_s22 = smov 0  }
   0x6 LB: > { %2236 = sst [smem:[#allocation8_spill]] %s1758_s13  ;;  %s1365_s23 = sadd.s32 4294967295, %s1794_s22   ;;  %s1794_s22 = sphi %s1877_s22, %s23_s22   ;;  %s1790_s21 = sphi %s1875_s21, %s2260_s21   ;;  %s1786_s20 = sphi %s1873_s20, %s2259_s20   ;;  %s1782_s19 = sphi %s1871_s19, %s2258_s19   ;;  %s1778_s18 = sphi %s1869_s18, %s2263_s18   ;;  %s1774_s17 = sphi %s1867_s17, %s2256_s17   ;;  %s1770_s16 = sphi %s1865_s16, %s2255_s16   ;;  %s1766_s15 = sphi %s1863_s15, %s2254_s15   ;;  %s1762_s14 = sphi %s1861_s14, %s2262_s14   ;;  %s1758_s13 = sphi %s1859_s13, %s2261_s13  }
   0x7   : > { %2237 = sst [smem:[#allocation9_spill]] %s1766_s15  ;;  %s1366_s24 = sadd.s32 4294967294, %s1794_s22  }
   0x8   : > { %2238 = sst [smem:[#allocation10_spill]] %s1782_s19  ;;  %s35_s25 = sadd.s32 1, %s1782_s19 }
   0x9   : > { %2239 = sst [smem:[#allocation11_spill]] %s1786_s20  ;;  %p36_p0 = scmp.ge.s32.totalorder %s35_s25, 4 }
   0xa   : > { %2240 = sst [smem:[#allocation12_spill]] %s1790_s21  ;;  %s38_s26 = sadd.s32 1, %s1786_s20 }
   0xb   : > { %2241 = sst [smem:[#allocation13_spill]] %s1794_s22  ;;  %s42_s27 = sadd.s32 1, %s1790_s21 }
   0xc   : > { %s271_s28 = smul.u32 %s1782_s19, %s1786_s20  ;;  %s2265_s25 = smov (%p36_p0, %s35_s25), 0 }
   0xd   : > { %2242 = sst [smem:[#allocation14_spill]] %s2265_s25  ;;  %s2267_s26 = smov (!%p36_p0, %s38_s26), %s1786_s20 }
   0xe   : > { %p288_p1 = scmp.ne.s32.totalorder %s1766_s15, %s1762_s14  ;;  %p289_p2 = scmp.eq.s32.totalorder %s1365_s23, 15 }
   0xf   : > { %p40_p3 = scmp.ge.s32.totalorder %s2267_s26, 2  ;;  %p294_p4 = scmp.ne.s32.totalorder %s1762_s14, %s1758_s13 }
  0x10   : > { %p1923_p5 = por %p289_p2, %p288_p1  ;;  %p295_p6 = scmp.eq.s32.totalorder %s1366_s24, 15 }
  0x11   : > { %s2269_s26 = smov (%p40_p3, %s2267_s26), 0  ;;  %s2271_s27 = smov (!%p40_p3, %s42_s27), %s1790_s21 }
  0x12   : > { %2244 = sst [smem:[#allocation15_spill]] %s2269_s26  ;;  %s272_s30 = smul.u32 %s2269_s26, %s2265_s25 }
  0x13   : > { %p1932_p7 = por %p295_p6, %p294_p4  ;;  %p44_p8 = scmp.ge.s32.totalorder %s2271_s27, 2 }
  0x14   : > { %p1369_p9 = scmp.ge.s32.totalorder %s1794_s22, 1  ;;  %s274_s12 = ssub.s32 %s271_s28, %s272_s30 }
  0x15   : > { %s2245_s11 = scalar_select %p1932_p7, 1, 0 }
  0x16   : > { %p361_p10 = scmp.lt.s32.totalorder %s1794_s22, 17  ;;  %s2273_s27 = smov (%p44_p8, %s2271_s27), 0 }
  0x17   : > { %2246 = sst [smem:[#allocation16_spill]] %s2245_s11  ;;  %s273_s23 = ssub.s32 %s1790_s21, %s2273_s27 }
  0x18   : > { %2247 = sst [smem:[#allocation17_spill]] %s2273_s27  ;;  %p362_p11 = pnand %p1369_p9, %p361_p10 }
  0x19   : > { %s275_s20 = sor.u32 %s274_s12, %s273_s23  ;;  %s278_s24 = sadd.s32 1, %s1766_s15 }
  0x1a   : > { %p276_p12 = scmp.eq.s32.totalorder %s275_s20, 0  ;;  %365 = sbr.rel (%p362_p11) target bundleno = 1314 (0x522), region = 60 }
  0x1b   : > { %s2235_s28 = sand.u32 (!%p362_p11), 1, %s1762_s14   ;;  %s407_s30 = ssub.s32 (!%p362_p11), 1, %s1774_s17 }
  0x1c   : > { %s1944_s19 = scalar_select %p276_p12, %s1766_s15, %s278_s24  }
  0x1d   : > { %s1370_s26 = sshll.u32 (!%p362_p11), %s2235_s28, 5  ;;  %s408_s25 = smul.u32 (!%p362_p11), %s1770_s16, %s407_s30 }
  0x1e   : > { %2248 = sst [smem:[#allocation18_spill]] %s1944_s19  ;;  %s409_s11 = smul.u32 (!%p362_p11), 3, %s1774_s17 }
  0x1f   : > { %p412_p13 = scmp.lt.s32.totalorder (!%p362_p11), %s1778_s18, 1  ;;  %s1959_s22 = scalar_lea.vmem (!%p362_p11), [#allocation5], %s1370_s26 }
  0x20   : > { %s410_s12 = sadd.s32 (!%p362_p11), %s409_s11, %s408_s25  ;;  %p1374_p1 = scmp.ne.s32.totalorder (!%p362_p11), %s1774_s17, 0 }
  0x21   : > { %s1371_s23 = sshll.u32 %s410_s12, 4  ;;  %v1669_v0 = vld [vmem:[%s2214_s1] sm:$0xff] (!%p1374_p1)   ;;  %vm507_vm0 = vcmask (!%p1374_p1), 1040384   ;;  %v1670_v1 = vld [vmem:[%s2214_s1 + $0x8] sm:$0xff] (!%p1374_p1)   ;;  %v1796_v3 = vmov (!%p1374_p1), 0   ;;  %vm482_vm1 = vcmask (!%p1374_p1), 269312  }
  0x22   : > { %s413_s20 = scalar_select %p412_p13, %s1778_s18, 1 }
  0x23   : > { %p414_p0 = scmp.lt.s32.totalorder %s1371_s23, 63  ;;  %430 = sbr.rel (%p1374_p1) target bundleno = 540 (0x21c), region = 64  ;;  %1477 = vmatprep.subr.bf16.mxu0 (!%p1374_p1), %v1669_v0  ;;  %v1671_v2 = vld [vmem:[%s2214_s1 + $0x10] ss:$0 sps:$4 sm:$0x11] (!%p1374_p1)   ;;  %v509_v4 = vsel (!%p1374_p1), %vm507_vm0, 65535, %v1796_v3 }
  0x24   : > { %s1372_s24 = sshll.u32 %s413_s20, 6  ;;  %1478 = vmatpush3.bf16.msra.mxu0 (!%p1374_p1), %v1669_v0  ;;  %v511_v7 = vand.u32 (!%p1374_p1), %v1671_v2, %v509_v4  ;;  %v1672_v30 = vld [vmem:[%s2216_s3] sm:$0xff] (!%p1374_p1)   ;;  %v1673_v31 = vld [vmem:[%s2216_s3 + $0x8] sm:$0xff] (!%p1374_p1)   ;;  %vm657_vm2 = vcmask (!%p1374_p1), 261120   ;;  %p1400_p2 = scmp.ne.s32.totalorder (!%p1374_p1), %s1770_s16, 0 }
  0x25   : > { %s2275_s23 = smov (!%p414_p0, %s1371_s23), 63  ;;  %1479 = vmatprep.subr.bf16.mxu0 (!%p1374_p1), %v1670_v1  ;;  %1499 = vmatprep.subr.bf16.mxu1 (!%p1374_p1), %v1672_v30  ;;  %v1375_v32 = vld [vmem:[%s2215_s2] ss:$0 sm:$0xff] (!%p1374_p1) }
  0x26   : > { %s417_s27 = sadd.s32 %s1372_s24, %s2275_s23  ;;  %1500 = vmatpush3.bf16.msra.mxu1 (!%p1374_p1), %v1672_v30  ;;  %s1431_s24 = sshll.u32 (!%p1374_p1), %s1770_s16, 6 }
  0x27   : > { %s1373_s21 = sshll.u32 %s417_s27, 3  ;;  %1501 = vmatprep.subr.bf16.mxu1 (!%p1374_p1), %v1673_v31  ;;  %s2022_s30 = scalar_lea.vmem (!%p1374_p1), [#allocation2], %s1431_s24 }
  0x28   : > { %s1957_s13 = scalar_lea.vmem %s2213_s0, %s1373_s21  ;;  %1480 = vmatpush3.bf16.msra.mxu0 (!%p1374_p1), %v1670_v1 }
  0x29   : > { %v431_v5 = vld [vmem:[%s1957_s13] sm:$0xff] (!%p1374_p1)  ;;  %v432_v6 = vld [vmem:[%s1957_s13 + $0x8] sm:$0xff] (!%p1374_p1)  ;;  %v433_v9 = vld [vmem:[%s1957_s13 + $0x10] sm:$0xff] (!%p1374_p1)  ;;  %1481 = vmatprep.subr.bf16.mxu0 (!%p1374_p1), %v511_v7 }
  0x2a   : > { %v453_v8 = vpack.c.bf16 %v432_v6, %v431_v5  ;;  %v434_v10 = vld [vmem:[%s1957_s13 + $0x18] sm:$0xff]  ;;  %v435_v11 = vld [vmem:[%s1957_s13 + $0x20] sm:$0xff]  ;;  %v436_v12 = vld [vmem:[%s1957_s13 + $0x28] sm:$0xff]  ;;  %1502 = vmatpush3.bf16.msra.mxu1 %v1673_v31  ;;  %vm839_vm3 = vcmask (!%p1400_p2), 253952  }
  0x2b   : > { %v454_v13 = vpack.c.bf16 %v434_v10, %v433_v9  ;;  %v455_v14 = vpack.c.bf16 %v436_v12, %v435_v11  ;;  %v437_v15 = vld [vmem:[%s1957_s13 + $0x30] sm:$0xff]  ;;  %v438_v16 = vld [vmem:[%s1957_s13 + $0x38] sm:$0xff]  ;;  %v439_v17 = vld [vmem:[%s1957_s13 + $0x40] sm:$0xff] }
  0x2c   : > { %1483 = vmatprep.mubr.msk.bf16.mxu0 %vm482_vm1, %v453_v8  ;;  %1482 = vmatpush3.bf16.msra.mxu0 %v511_v7  ;;  %v440_v18 = vld [vmem:[%s1957_s13 + $0x48] sm:$0xff]  ;;  %v456_v19 = vpack.c.bf16 %v438_v16, %v437_v15  ;;  %v441_v21 = vld [vmem:[%s1957_s13 + $0x50] sm:$0xff]  ;;  %v442_v22 = vld [vmem:[%s1957_s13 + $0x58] sm:$0xff] }
  0x2d   : > { %v457_v20 = vpack.c.bf16 %v440_v18, %v439_v17  ;;  %v443_v23 = vld [vmem:[%s1957_s13 + $0x60] sm:$0xff]  ;;  %v444_v24 = vld [vmem:[%s1957_s13 + $0x68] sm:$0xff]  ;;  %v458_v25 = vpack.c.bf16 %v442_v22, %v441_v21  ;;  %v445_v27 = vld [vmem:[%s1957_s13 + $0x70] sm:$0xff] }
  0x2e   : > { %v459_v26 = vpack.c.bf16 %v444_v24, %v443_v23  ;;  %v446_v28 = vld [vmem:[%s1957_s13 + $0x78] sm:$0xff] }
  0x2f   : > { %1484 = vmatmul.mubr.msk.bf16.vlgmr.msra.gmra.mrb[0].mxu0 %vm482_vm1, %v454_v13  ;;  %v460_v29 = vpack.c.bf16 %v446_v28, %v445_v27 }
  0x30   : > { %1487 = vmatprep.mubr.msk.bf16.mxu0 %vm482_vm1, %v455_v14 }
  0x37   : > { %1488 = vmatmul.mubr.msk.bf16.gmra.mrb[4].mxu0 %vm482_vm1, %v456_v19 }
  0x38   : > { %1491 = vmatprep.mubr.msk.bf16.mxu0 %vm482_vm1, %v457_v20 }
  0x3f   : > { %1492 = vmatmul.mubr.msk.bf16.gmra.mrb[8].mxu0 %vm482_vm1, %v458_v25 }
  0x40   : > { %1495 = vmatprep.mubr.msk.bf16.mxu0 %vm482_vm1, %v459_v26  ;;  %v2015_v26 = vld [vmem:[%s2217_s4] ss:$0 sm:$0xff] }
  0x47   : > { %1496 = vmatmul.mubr.msk.bf16.gmra.mrb[12].mxu0 %vm482_vm1, %v460_v29 }
 0x102   : > { %v1485_v33 = vpop.f32.mrb[0].mxu0 }
 0x103   : > { %v556_v34 = vadd.f32 %v1485_v33, %v1375_v32  ;;  %v547_v35 = vpop.f32.mrb[1].mxu0 }
 0x104   : > { %v548_v36 = vadd.f32 %v1375_v32, %v547_v35  ;;  %v1486_v37 = vpop.f32.mrb[2].mxu0 }
 0x105   : > { %v559_v38 = vadd.f32 %v1486_v37, %v1375_v32  ;;  %v550_v39 = vpop.f32.mrb[3].mxu0  ;;  %v612_v41 = vmax.f32 %v556_v34, 0.0 }
 0x106   : > { %v551_v40 = vadd.f32 %v1375_v32, %v550_v39  ;;  %v610_v43 = vmax.f32 %v548_v36, 0.0 }
 0x107   : > { %v613_v42 = vmax.f32 %v559_v38, 0.0 }
 0x108   : > { %v611_v44 = vmax.f32 %v551_v40, 0.0 }
 0x109   : > { %v627_v45 = vpack.c.bf16 %v613_v42, %v612_v41 }
 0x10a   : > { %v1489_v46 = vpop.f32.mrb[4].mxu0  ;;  %v626_v47 = vpack.c.bf16 %v611_v44, %v610_v43 }
 0x10b   : > { %v572_v48 = vadd.f32 %v1489_v46, %v1375_v32  ;;  %v563_v49 = vpop.f32.mrb[5].mxu0 }
 0x10c   : > { %v564_v50 = vadd.f32 %v1375_v32, %v563_v49  ;;  %v1490_v51 = vpop.f32.mrb[6].mxu0  ;;  %1503 = vmatprep.mubr.msk.bf16.mxu1 %vm657_vm2, %v626_v47 }
 0x10d   : > { %v575_v52 = vadd.f32 %v1490_v51, %v1375_v32  ;;  %v566_v53 = vpop.f32.mrb[7].mxu0  ;;  %1504 = vmatmul.mubr.msk.bf16.vlgmr.msra.gmra.mrb[0].mxu1 %vm657_vm2, %v627_v45  ;;  %v616_v55 = vmax.f32 %v572_v48, 0.0 }
 0x10e   : > { %v567_v54 = vadd.f32 %v1375_v32, %v566_v53  ;;  %v614_v57 = vmax.f32 %v564_v50, 0.0 }
 0x10f   : > { %v617_v56 = vmax.f32 %v575_v52, 0.0 }
 0x110   : > { %v615_v58 = vmax.f32 %v567_v54, 0.0 }
 0x111   : > { %v629_v59 = vpack.c.bf16 %v617_v56, %v616_v55 }
 0x112   : > { %v628_v60 = vpack.c.bf16 %v615_v58, %v614_v57  ;;  %v1493_v61 = vpop.f32.mrb[8].mxu0 }
 0x113   : > { %v588_v62 = vadd.f32 %v1493_v61, %v1375_v32  ;;  %v579_v63 = vpop.f32.mrb[9].mxu0 }
 0x114   : > { %v580_v0 = vadd.f32 %v1375_v32, %v579_v63  ;;  %v1494_v1 = vpop.f32.mrb[10].mxu0  ;;  %1507 = vmatprep.mubr.msk.bf16.mxu1 %vm657_vm2, %v628_v60 }
 0x115   : > { %v591_v2 = vadd.f32 %v1494_v1, %v1375_v32  ;;  %v582_v3 = vpop.f32.mrb[11].mxu0  ;;  %1508 = vmatmul.mubr.msk.bf16.gmra.mrb[4].mxu1 %vm657_vm2, %v629_v59  ;;  %v620_v5 = vmax.f32 %v588_v62, 0.0 }
 0x116   : > { %v583_v4 = vadd.f32 %v1375_v32, %v582_v3  ;;  %v618_v7 = vmax.f32 %v580_v0, 0.0 }
 0x117   : > { %v621_v6 = vmax.f32 %v591_v2, 0.0 }
 0x118   : > { %v619_v8 = vmax.f32 %v583_v4, 0.0 }
 0x119   : > { %v631_v9 = vpack.c.bf16 %v621_v6, %v620_v5 }
 0x11a   : > { %v630_v10 = vpack.c.bf16 %v619_v8, %v618_v7  ;;  %v1497_v11 = vpop.f32.mrb[12].mxu0 }
 0x11b   : > { %v604_v12 = vadd.f32 %v1497_v11, %v1375_v32  ;;  %v595_v13 = vpop.f32.mrb[13].mxu0 }
 0x11c   : > { %v596_v14 = vadd.f32 %v1375_v32, %v595_v13  ;;  %v1498_v15 = vpop.f32.mrb[14].mxu0  ;;  %1511 = vmatprep.mubr.msk.bf16.mxu1 %vm657_vm2, %v630_v10 }
 0x11d   : > { %v607_v16 = vadd.f32 %v1498_v15, %v1375_v32  ;;  %v598_v17 = vpop.f32.mrb[15].mxu0  ;;  %1512 = vmatmul.mubr.msk.bf16.gmra.mrb[8].mxu1 %vm657_vm2, %v631_v9  ;;  %v624_v19 = vmax.f32 %v604_v12, 0.0 }
 0x11e   : > { %v599_v18 = vadd.f32 %v1375_v32, %v598_v17  ;;  %v622_v21 = vmax.f32 %v596_v14, 0.0 }
 0x11f   : > { %v625_v20 = vmax.f32 %v607_v16, 0.0 }
 0x120   : > { %v623_v22 = vmax.f32 %v599_v18, 0.0 }
 0x121   : > { %v633_v23 = vpack.c.bf16 %v625_v20, %v624_v19 }
 0x122   : > { %v632_v24 = vpack.c.bf16 %v623_v22, %v622_v21 }
 0x124   : > { %1515 = vmatprep.mubr.msk.bf16.mxu1 %vm657_vm2, %v632_v24 }
 0x125   : > { %1516 = vmatmul.mubr.msk.bf16.gmra.mrb[12].mxu1 %vm657_vm2, %v633_v23 }
 0x1e0   : > { %v1505_v25 = vpop.f32.mrb[0].mxu1 }
 0x1e1   : > { %v716_v27 = vpop.f32.mrb[1].mxu1  ;;  %v725_v29 = vadd.f32 %v1505_v25, %v2015_v26 }
 0x1e2   : > { %v1506_v28 = vpop.f32.mrb[2].mxu1  ;;  %v717_v32 = vadd.f32 %v2015_v26, %v716_v27 }
 0x1e3   : > { %v728_v30 = vadd.f32 %v1506_v28, %v2015_v26  ;;  %v719_v31 = vpop.f32.mrb[3].mxu1  ;;  %v800_v41 = vsel %vm657_vm2, %v725_v29, -inf }
 0x1e4   : > { %v720_v33 = vadd.f32 %v2015_v26, %v719_v31  ;;  %v798_v45 = vsel %vm657_vm2, %v717_v32, -inf }
 0x1e5   : > { %v780_v34 = vpack.c.bf16 %v728_v30, %v725_v29  ;;  %v801_v49 = vsel %vm657_vm2, %v728_v30, -inf }
 0x1e6   : > { %v779_v35 = vpack.c.bf16 %v720_v33, %v717_v32  ;;  %v799_v53 = vsel %vm657_vm2, %v720_v33, -inf }
 0x1e7   : > { %791 = vst.msk [vmem:[%s2022_s30 + $0x8] sm:$0xff] %vm657_vm2, %v780_v34 }
 0x1e8   : > { %790 = vst.msk [vmem:[%s2022_s30] sm:$0xff] %vm657_vm2, %v779_v35  ;;  %v1509_v36 = vpop.f32.mrb[4].mxu1 }
 0x1e9   : > { %v741_v37 = vadd.f32 %v1509_v36, %v2015_v26  ;;  %v732_v38 = vpop.f32.mrb[5].mxu1 }
 0x1ea   : > { %v733_v39 = vadd.f32 %v2015_v26, %v732_v38  ;;  %v1510_v40 = vpop.f32.mrb[6].mxu1 }
 0x1eb   : > { %v806_v42 = vsel %vm657_vm2, %v741_v37, -inf  ;;  %v744_v43 = vadd.f32 %v1510_v40, %v2015_v26  ;;  %v735_v44 = vpop.f32.mrb[7].mxu1 }
 0x1ec   : > { %v807_v46 = vmax.f32 %v800_v41, %v806_v42  ;;  %v802_v47 = vsel %vm657_vm2, %v733_v39, -inf  ;;  %v736_v48 = vadd.f32 %v2015_v26, %v735_v44 }
 0x1ed   : > { %v803_v50 = vmax.f32 %v798_v45, %v802_v47  ;;  %v782_v51 = vpack.c.bf16 %v744_v43, %v741_v37  ;;  %v808_v52 = vsel %vm657_vm2, %v744_v43, -inf }
 0x1ee   : > { %v809_v54 = vmax.f32 %v801_v49, %v808_v52  ;;  %v781_v55 = vpack.c.bf16 %v736_v48, %v733_v39  ;;  %v804_v56 = vsel %vm657_vm2, %v736_v48, -inf }
 0x1ef   : > { %793 = vst.msk [vmem:[%s2022_s30 + $0x18] sm:$0xff] %vm657_vm2, %v782_v51  ;;  %v805_v57 = vmax.f32 %v799_v53, %v804_v56 }
 0x1f0   : > { %792 = vst.msk [vmem:[%s2022_s30 + $0x10] sm:$0xff] %vm657_vm2, %v781_v55  ;;  %v1513_v58 = vpop.f32.mrb[8].mxu1 }
 0x1f1   : > { %v757_v59 = vadd.f32 %v1513_v58, %v2015_v26  ;;  %v748_v60 = vpop.f32.mrb[9].mxu1 }
 0x1f2   : > { %v749_v61 = vadd.f32 %v2015_v26, %v748_v60  ;;  %v1514_v62 = vpop.f32.mrb[10].mxu1 }
 0x1f3   : > { %v814_v63 = vsel %vm657_vm2, %v757_v59, -inf  ;;  %v760_v0 = vadd.f32 %v1514_v62, %v2015_v26  ;;  %v751_v1 = vpop.f32.mrb[11].mxu1 }
 0x1f4   : > { %v815_v2 = vmax.f32 %v807_v46, %v814_v63  ;;  %v810_v3 = vsel %vm657_vm2, %v749_v61, -inf  ;;  %v752_v4 = vadd.f32 %v2015_v26, %v751_v1 }
 0x1f5   : > { %v811_v5 = vmax.f32 %v803_v50, %v810_v3  ;;  %v784_v6 = vpack.c.bf16 %v760_v0, %v757_v59  ;;  %v816_v7 = vsel %vm657_vm2, %v760_v0, -inf }
 0x1f6   : > { %v817_v8 = vmax.f32 %v809_v54, %v816_v7  ;;  %v783_v9 = vpack.c.bf16 %v752_v4, %v749_v61  ;;  %v812_v10 = vsel %vm657_vm2, %v752_v4, -inf }
 0x1f7   : > { %795 = vst.msk [vmem:[%s2022_s30 + $0x28] sm:$0xff] %vm657_vm2, %v784_v6  ;;  %v813_v11 = vmax.f32 %v805_v57, %v812_v10 }
 0x1f8   : > { %794 = vst.msk [vmem:[%s2022_s30 + $0x20] sm:$0xff] %vm657_vm2, %v783_v9  ;;  %v1517_v12 = vpop.f32.mrb[12].mxu1 }
 0x1f9   : > { %v773_v13 = vadd.f32 %v1517_v12, %v2015_v26  ;;  %v764_v14 = vpop.f32.mrb[13].mxu1 }
 0x1fa   : > { %v765_v15 = vadd.f32 %v2015_v26, %v764_v14  ;;  %v1518_v16 = vpop.f32.mrb[14].mxu1 }
 0x1fb   : > { %v822_v17 = vsel %vm657_vm2, %v773_v13, -inf  ;;  %v776_v18 = vadd.f32 %v1518_v16, %v2015_v26  ;;  %v767_v19 = vpop.f32.mrb[15].mxu1 }
 0x1fc   : > { %v823_v20 = vmax.f32 %v815_v2, %v822_v17  ;;  %v818_v21 = vsel %vm657_vm2, %v765_v15, -inf  ;;  %v768_v22 = vadd.f32 %v2015_v26, %v767_v19 }
 0x1fd   : > { %v819_v23 = vmax.f32 %v811_v5, %v818_v21  ;;  %v786_v24 = vpack.c.bf16 %v776_v18, %v773_v13  ;;  %v824_v25 = vsel %vm657_vm2, %v776_v18, -inf }
 0x1fe   : > { %v825_v27 = vmax.f32 %v817_v8, %v824_v25  ;;  %v785_v28 = vpack.c.bf16 %v768_v22, %v765_v15  ;;  %v820_v29 = vsel %vm657_vm2, %v768_v22, -inf }
 0x1ff   : > { %797 = vst.msk [vmem:[%s2022_s30 + $0x38] sm:$0xff] %vm657_vm2, %v786_v24  ;;  %v821_v30 = vmax.f32 %v813_v11, %v820_v29 }
 0x200   : > { %v827_v31 = vmax.f32 %v823_v20, %v825_v27  ;;  %796 = vst.msk [vmem:[%s2022_s30 + $0x30] sm:$0xff] %vm657_vm2, %v785_v28 }
 0x201   : > { %v826_v32 = vmax.f32 %v819_v23, %v821_v30 }
 0x203   : > { %v828_v33 = vmax.f32 %v826_v32, %v827_v31 }
 0x205   : > { %v829_v34 = vrot.slane %v828_v33, 4 }
 0x207   : > { %v830_v35 = vmax.f32 %v828_v33, %v829_v34 }
 0x209   : > { %v831_v36 = vrot.slane %v830_v35, 2  ;;  %838 = sbr.rel (%p1400_p2) target bundleno = 530 (0x212), region = 68 }
 0x20b   : > { %v832_v26 = vmax.f32 %v830_v35, %v831_v36 }
 0x20d   : > { %v833_v37 = vrot.slane %v832_v26, 1 }
 0x20f   : > { %v834_v38 = vmax.f32 %v832_v26, %v833_v37 }
 0x211   : > { %840 = vst.msk [vmem:[#allocation3] sm:$0x1] %vm839_vm3, %v834_v38 }
 0x212 PF: > { %p1401_p3 = scmp.le.s32.totalorder %s1770_s16, 0 }
 0x213   : > { %vm847_vm4 = vcmask (!%p1401_p3), 253952  }
 0x214   : > { %844 = sbr.rel (%p1401_p3) target bundleno = 540 (0x21c), region = 72 }
 0x218   : > { %v845_v39 = vld [vmem:[#allocation3] sm:$0x1] (!%p1401_p3) }
 0x219   : > { %v846_v40 = vmax.f32 (!%p1401_p3), %v845_v39, %v834_v38 }
 0x21b   : > { %848 = vst.msk [vmem:[#allocation3] sm:$0x1] %vm847_vm4, %v846_v40 }
 0x21c PF: > { %p1402_p4 = scmp.ne.s32.totalorder %s1774_s17, 1 }
 0x21d   : > { %p1403_p6 = scmp.ne.s32.totalorder (!%p1402_p4), %s1770_s16, 0 }
 0x21e   : > { %852 = sbr.rel (%p1402_p4) target bundleno = 1285 (0x505), region = 76 }
 0x225   : > { %856 = sbr.rel (%p1403_p6) target bundleno = 773 (0x305), region = 80  ;;  %v1674_v41 = vld [vmem:[%s2219_s6] sm:$0xff] (!%p1403_p6)   ;;  %v1797_v42 = vmov (!%p1403_p6), 0.0   ;;  %v1675_v43 = vld [vmem:[%s2219_s6 + $0x8] sm:$0xff] (!%p1403_p6)   ;;  %vm1798_vm5 = vmmov (!%p1403_p6), 0   ;;  %vm876_vm6 = vcmask (!%p1403_p6), 261120  }
 0x226   : > { %1519 = vmatprep.subr.bf16.mxu0 (!%p1403_p6), %v1797_v42  ;;  %1523 = vmatprep.mubr.msk.bf16.mxu0 (!%p1403_p6), %vm1798_vm5, %v1797_v42  ;;  %v857_v44 = vld [vmem:[#allocation3] sm:$0x1] (!%p1403_p6)  ;;  %vm920_vm7 = vcmask (!%p1403_p6), 516096  }
 0x227   : > { %1520 = vmatpush3.bf16.msra.mxu0 (!%p1403_p6), %v1674_v41  ;;  %v858_v45 = vpack.c.bf16 (!%p1403_p6), %v857_v44, %v857_v44  ;;  %v863_v46 = vld [vmem:[%s2220_s7] sm:$0x1] (!%p1403_p6) }
 0x228   : > { %1521 = vmatprep.subr.bf16.mxu0 (!%p1403_p6), %v1797_v42 }
 0x22b   : > { %1522 = vmatpush3.bf16.msra.mxu0 (!%p1403_p6), %v1675_v43 }
 0x22e   : > { %1524 = vmatmul.mubr.msk.bf16.vlgmr.msra.gmra.mrb[0].mxu0 %vm876_vm6, %v858_v45 }
 0x301   : > { %v914_v47 = vpop.f32.mrb[0].mxu0 }
 0x302   : > { %v915_v48 = vadd.f32 %v914_v47, %v863_v46  ;;  %v1525_v49 = vpop.f32.mrb[1].mxu0 }
 0x303   : > { %v917_v50 = vpop.f32.mrb[2].mxu0 }
 0x304   : > { %921 = vst.msk [vmem:[#allocation4] sm:$0x1] %vm920_vm7, %v915_v48  ;;  %v1526_v51 = vpop.f32.mrb[3].mxu0 }
 0x305 PF: > { %v1678_v52 = vld [vmem:[%s2218_s5] sm:$0xff]   ;;  %s1432_s12 = sshll.u32 %s1770_s16, 6  ;;  %v1679_v53 = vld [vmem:[%s2218_s5 + $0x8] sm:$0xff]   ;;  %vm956_vm8 = vcmask 261120   ;;  %v1682_v59 = vld [vmem:[%s2221_s8 + $0x10] sm:$0xff]   ;;  %vm1174_vm9 = vcmask 523264  }
 0x306   : > { %1527 = vmatprep.subr.bf16.mxu0 %v1678_v52  ;;  %s924_s20 = scalar_lea.vmem [#allocation2], %s1432_s12  ;;  %v1680_v55 = vld [vmem:[%s2221_s8] sm:$0xff]   ;;  %v1681_v57 = vld [vmem:[%s2221_s8 + $0x8] sm:$0xff]   ;;  %v1683_v61 = vld [vmem:[%s2221_s8 + $0x18] sm:$0xff]   ;;  %v1799_v4 = vmov 0  }
 0x307   : > { %v925_v54 = vld [vmem:[%s924_s20] sm:$0xff]  ;;  %1528 = vmatpush3.bf16.msra.mxu0 %v1678_v52  ;;  %v926_v56 = vld [vmem:[%s924_s20 + $0x8] sm:$0xff]  ;;  %1158 = vxpose.xlu0.c.b16.start [1/4] (short) (narrow) %v1680_v55, 32  ;;  %v927_v58 = vld [vmem:[%s924_s20 + $0x10] sm:$0xff] }
 0x308   : > { %1531 = vmatprep.mubr.msk.bf16.mxu0 %vm956_vm8, %v925_v54  ;;  %1529 = vmatprep.subr.bf16.mxu0 %v1679_v53  ;;  %v928_v60 = vld [vmem:[%s924_s20 + $0x18] sm:$0xff]  ;;  %v929_v62 = vld [vmem:[%s924_s20 + $0x20] sm:$0xff]  ;;  %v930_v63 = vld [vmem:[%s924_s20 + $0x28] sm:$0xff] }
 0x309   : > { %v931_v0 = vld [vmem:[%s924_s20 + $0x30] sm:$0xff]  ;;  %v932_v1 = vld [vmem:[%s924_s20 + $0x38] sm:$0xff]  ;;  %v1110_v3 = vld [vmem:[%s2222_s9] sm:$0xff]  ;;  %1676 = vset.pattern.permute.xlu1 %v1799_v4 }
 0x30a   : > { %1116 = vperm.xlu1 %1676, %v1110_v3   ;;  %v1111_v5 = vld [vmem:[%s2222_s9 + $0x8] sm:$0xff]  ;;  %v1112_v6 = vld [vmem:[%s2222_s9 + $0x10] sm:$0xff]  ;;  %v1113_v7 = vld [vmem:[%s2222_s9 + $0x18] sm:$0xff] }
 0x30b   : > { %1530 = vmatpush3.bf16.msra.mxu0 %v1679_v53  ;;  %1159 = vxpose.xlu0.c.b16.cont [2/4] (short) (narrow) %v1681_v57, 32  ;;  %v1409_v8 = vld [vmem:[#allocation4] ss:$0 sm:$0xff] }
 0x30e   : > { %1532 = vmatmul.mubr.msk.bf16.vlgmr.msra.gmra.mrb[0].mxu0 %vm956_vm8, %v926_v56  ;;  %1121 = vperm.xlu1 %1676, %v1111_v5  }
 0x30f   : > { %1535 = vmatprep.mubr.msk.bf16.mxu0 %vm956_vm8, %v927_v58  ;;  %1160 = vxpose.xlu0.c.b16.cont [3/4] (short) (narrow) %v1682_v59, 32 }
 0x312   : > { %1126 = vperm.xlu1 %1676, %v1112_v6  }
 0x313   : > { %1161 = vxpose.xlu0.c.b16.end [4/4] (short) (narrow) %v1683_v61, 32 }
 0x316   : > { %1536 = vmatmul.mubr.msk.bf16.gmra.mrb[4].mxu0 %vm956_vm8, %v928_v60  ;;  %1131 = vperm.xlu1 %1676, %v1113_v7  }
 0x317   : > { %1539 = vmatprep.mubr.msk.bf16.mxu0 %vm956_vm8, %v929_v62 }
 0x31c   : > { %1677 = vset.pattern.permute.xlu0 %v1799_v4 }
 0x31e   : > { %1540 = vmatmul.mubr.msk.bf16.gmra.mrb[8].mxu0 %vm956_vm8, %v930_v63 }
 0x31f   : > { %1543 = vmatprep.mubr.msk.bf16.mxu0 %vm956_vm8, %v931_v0 }
 0x326   : > { %1544 = vmatmul.mubr.msk.bf16.gmra.mrb[12].mxu0 %vm956_vm8, %v932_v1 }
 0x36d   : > { %v1166_v2 = vpop.trf.xlu0 }
 0x36e   : > { %1563 = vmatprep.mubr.msk.bf16.mxu1 %vm1174_vm9, %v1166_v2 }
 0x3e1   : > { %v1533_v9 = vpop.f32.mrb[0].mxu0 }
 0x3e2   : > { %v1024_v10 = vadd.f32 %v1533_v9, %v1409_v8  ;;  %v1015_v11 = vpop.f32.mrb[1].mxu0  ;;  %v1167_v9 = vpop.trf.xlu0 }
 0x3e3   : > { %v1016_v12 = vadd.f32 %v1409_v8, %v1015_v11  ;;  %v1534_v13 = vpop.f32.mrb[2].mxu0 }
 0x3e4   : > { %v1027_v14 = vadd.f32 %v1534_v13, %v1409_v8  ;;  %v1018_v15 = vpop.f32.mrb[3].mxu0  ;;  %v1080_v17 = vmax.f32 %v1024_v10, 0.0  ;;  %v1117_v10 = vpop.permute.xlu1 %1116 }
 0x3e5   : > { %v1019_v16 = vadd.f32 %v1409_v8, %v1018_v15  ;;  %v1078_v19 = vmax.f32 %v1016_v12, 0.0 }
 0x3e6   : > { %v1081_v18 = vmax.f32 %v1027_v14, 0.0 }
 0x3e7   : > { %v1079_v20 = vmax.f32 %v1019_v16, 0.0 }
 0x3e8   : > { %v1095_v21 = vpack.c.bf16 %v1081_v18, %v1080_v17  ;;  %v1122_v11 = vpop.permute.xlu1 %1121 }
 0x3e9   : > { %v1094_v22 = vpack.c.bf16 %v1079_v20, %v1078_v19  ;;  %v1537_v23 = vpop.f32.mrb[4].mxu0 }
 0x3ea   : > { %v1040_v24 = vadd.f32 %v1537_v23, %v1409_v8  ;;  %v1031_v25 = vpop.f32.mrb[5].mxu0  ;;  %v1185_v41 = vsel %vm1174_vm9, %v1095_v21, 0 }
 0x3eb   : > { %1567 = vmatprep.subr.msk.bf16.mxu1 %vm1174_vm9, %v1094_v22  ;;  %v1182_v27 = vsel %vm1174_vm9, %v1094_v22, 0  ;;  %v1032_v28 = vadd.f32 %v1409_v8, %v1031_v25  ;;  %v1538_v29 = vpop.f32.mrb[6].mxu0 }
 0x3ec   : > { %1548 = vmatpush3.bf16.xpose.msra.mxu1 %v1182_v27  ;;  %v1084_v30 = vmax.f32 %v1040_v24, 0.0  ;;  %v1043_v31 = vadd.f32 %v1538_v29, %v1409_v8  ;;  %v1034_v32 = vpop.f32.mrb[7].mxu0  ;;  %v1127_v12 = vpop.permute.xlu1 %1126 }
 0x3ed   : > { %1568 = vmatprep.subr.msk.bf16.mxu1 %vm1174_vm9, %v1095_v21  ;;  %v1082_v33 = vmax.f32 %v1032_v28, 0.0  ;;  %v1035_v34 = vadd.f32 %v1409_v8, %v1034_v32 }
 0x3ee   : > { %v1085_v35 = vmax.f32 %v1043_v31, 0.0 }
 0x3ef   : > { %v1083_v36 = vmax.f32 %v1035_v34, 0.0 }
 0x3f0   : > { %v1097_v26 = vpack.c.bf16 %v1085_v35, %v1084_v30  ;;  %v1132_v16 = vpop.permute.xlu1 %1131 }
 0x3f1   : > { %v1096_v37 = vpack.c.bf16 %v1083_v36, %v1082_v33  ;;  %v1541_v38 = vpop.f32.mrb[8].mxu0 }
 0x3f2   : > { %v1056_v39 = vadd.f32 %v1541_v38, %v1409_v8  ;;  %v1047_v40 = vpop.f32.mrb[9].mxu0  ;;  %v1191_v4 = vsel %vm1174_vm9, %v1097_v26, 0 }
 0x3f3   : > { %v1048_v42 = vadd.f32 %v1409_v8, %v1047_v40  ;;  %v1542_v43 = vpop.f32.mrb[10].mxu0  ;;  %v1188_v56 = vsel %vm1174_vm9, %v1096_v37, 0 }
 0x3f4   : > { %1550 = vmatpush3.bf16.xpose.msra.mxu1 %v1185_v41  ;;  %v1088_v44 = vmax.f32 %v1056_v39, 0.0  ;;  %v1059_v45 = vadd.f32 %v1542_v43, %v1409_v8  ;;  %v1050_v46 = vpop.f32.mrb[11].mxu0 }
 0x3f5   : > { %1569 = vmatprep.subr.msk.bf16.mxu1 %vm1174_vm9, %v1096_v37  ;;  %v1086_v47 = vmax.f32 %v1048_v42, 0.0  ;;  %v1051_v48 = vadd.f32 %v1409_v8, %v1050_v46 }
 0x3f6   : > { %v1089_v49 = vmax.f32 %v1059_v45, 0.0 }
 0x3f7   : > { %v1087_v50 = vmax.f32 %v1051_v48, 0.0 }
 0x3f8   : > { %v1099_v51 = vpack.c.bf16 %v1089_v49, %v1088_v44 }
 0x3f9   : > { %v1098_v52 = vpack.c.bf16 %v1087_v50, %v1086_v47  ;;  %v1545_v53 = vpop.f32.mrb[12].mxu0 }
 0x3fa   : > { %v1072_v54 = vadd.f32 %v1545_v53, %v1409_v8  ;;  %v1063_v55 = vpop.f32.mrb[13].mxu0  ;;  %v1197_v6 = vsel %vm1174_vm9, %v1099_v51, 0 }
 0x3fb   : > { %v1064_v57 = vadd.f32 %v1409_v8, %v1063_v55  ;;  %v1546_v58 = vpop.f32.mrb[14].mxu0  ;;  %v1194_v5 = vsel %vm1174_vm9, %v1098_v52, 0 }
 0x3fc   : > { %1552 = vmatpush3.bf16.xpose.msra.mxu1 %v1188_v56  ;;  %v1092_v59 = vmax.f32 %v1072_v54, 0.0  ;;  %v1075_v60 = vadd.f32 %v1546_v58, %v1409_v8  ;;  %v1066_v61 = vpop.f32.mrb[15].mxu0 }
 0x3fd   : > { %1570 = vmatprep.subr.msk.bf16.mxu1 %vm1174_vm9, %v1097_v26  ;;  %v1090_v62 = vmax.f32 %v1064_v57, 0.0  ;;  %v1067_v63 = vadd.f32 %v1409_v8, %v1066_v61 }
 0x3fe   : > { %v1093_v0 = vmax.f32 %v1075_v60, 0.0 }
 0x3ff   : > { %v1091_v1 = vmax.f32 %v1067_v63, 0.0 }
 0x400   : > { %v1101_v2 = vpack.c.bf16 %v1093_v0, %v1092_v59 }
 0x401   : > { %v1100_v3 = vpack.c.bf16 %v1091_v1, %v1090_v62 }
 0x402   : > { %v1203_v8 = vsel %vm1174_vm9, %v1101_v2, 0 }
 0x403   : > { %v1200_v7 = vsel %vm1174_vm9, %v1100_v3, 0 }
 0x404   : > { %1554 = vmatpush3.bf16.xpose.msra.mxu1 %v1191_v4 }
 0x405   : > { %1571 = vmatprep.subr.msk.bf16.mxu1 %vm1174_vm9, %v1098_v52 }
 0x40c   : > { %1556 = vmatpush3.bf16.xpose.msra.mxu1 %v1194_v5 }
 0x40d   : > { %1572 = vmatprep.subr.msk.bf16.mxu1 %vm1174_vm9, %v1099_v51 }
 0x414   : > { %1558 = vmatpush3.bf16.xpose.msra.mxu1 %v1197_v6 }
 0x415   : > { %1573 = vmatprep.subr.msk.bf16.mxu1 %vm1174_vm9, %v1100_v3 }
 0x41c   : > { %1560 = vmatpush3.bf16.xpose.msra.mxu1 %v1200_v7 }
 0x41d   : > { %1574 = vmatprep.subr.msk.bf16.mxu1 %vm1174_vm9, %v1101_v2 }
 0x424   : > { %1562 = vmatpush3.bf16.xpose.msra.mxu1 %v1203_v8 }
 0x42b   : > { %1564 = vmatmul.mubr.msk.bf16.vlgmr.msra.gmra.mrb[0].mxu1 %vm1174_vm9, %v1167_v9 }
 0x4fe   : > { %v1565_v13 = vpop.f32.mrb[0].mxu1 }
 0x4ff   : > { %v1248_v14 = vadd.f32 %v1565_v13, %v1127_v12  ;;  %v1239_v15 = vpop.f32.mrb[1].mxu1 }
 0x500   : > { %v1240_v17 = vadd.f32 %v1239_v15, %v1117_v10  ;;  %v1566_v18 = vpop.f32.mrb[2].mxu1 }
 0x501   : > { %1256 = vst [vmem:[%s1959_s22 + $0x10] sm:$0xff] %v1248_v14  ;;  %v1251_v19 = vadd.f32 %v1566_v18, %v1132_v16  ;;  %v1242_v20 = vpop.f32.mrb[3].mxu1 }
 0x502   : > { %1254 = vst [vmem:[%s1959_s22] sm:$0xff] %v1240_v17  ;;  %v1243_v21 = vadd.f32 %v1242_v20, %v1122_v11 }
 0x503   : > { %1257 = vst [vmem:[%s1959_s22 + $0x18] sm:$0xff] %v1251_v19 }
 0x504   : > { %1255 = vst [vmem:[%s1959_s22 + $0x8] sm:$0xff] %v1243_v21 }
 0x505 PF: > { %s1266_s25 = smul.u32 %s1770_s16, %s1774_s17  ;;  %s1427_s27 = sshll.u32 %s1778_s18, 4 }
 0x506   : > { %s1274_s15 = sshll.u32 %s1959_s22, 4  ;;  %s2249_s12 = sand.u32 1, %s1762_s14   ;;  %s2146_s15 = int_to_ptr.vmem [resolvable:$true] %s1274_s15 }
 0x507   : > { %s1271_s19 = sadd.s32 %s1427_s27, %s1266_s25  ;;  %s2155_s23 = scalar_lea.sflag [#allocation6], %s2249_s12 }
 0x508   : > { %s1428_s21 = sshll.u32 %s1271_s19, 7  ;;  %s1684_s13 = scalar_lea.vmem %s2146_s15, 512 }
 0x509   : > { %s2151_s28 = scalar_lea.hbm %s2223_s10, %s1428_s21  ;;  %p1685_p8 = scmp.ne.s32.totalorder %s2146_s15, %s1684_s13 }
 0x50a   : > { %s1800_s16 = smov [#allocation5]  }
 0x50b   : > { %p1686_p9 = pnand %p1685_p8, %p1923_p5  ;;  %s1688_s17 = sshll.u32 %s1800_s16, 4  ;;  %s1689_s17 = int_to_ptr.vmem [resolvable:$false] %s1688_s17 }
 0x50c   : > { %s1690_s18 = scalar_lea.vmem %s1689_s17, 1024  ;;  %p1691_p11 = scmp.lt.s32.totalorder %s2146_s15, %s1689_s17 }
 0x50d   : > { %p1687_p10 = pneg %p1686_p9  ;;  %p1692_p12 = scmp.lt.s32.totalorder %s1690_s18, %s1684_s13 }
 0x50f   : > { %p1693_p13 = por %p1692_p12, %p1691_p11 }
 0x511   : > { %p1694_p0 = pnand %p1693_p13, %p1687_p10 }
 0x513   : > { %1697 = shalt.err (!%p1694_p0)
}
 0x514   : > { %s1698_s22 = scalar_lea.hbm %s2151_s28, 512  ;;  %s1702_s30 = scalar_lea.hbm %s2223_s10, 4096 }
 0x515   : > { %p1699_p1 = scmp.ne.s32.totalorder %s2151_s28, %s1698_s22  ;;  %p1703_p4 = scmp.lt.u32.totalorder %s2151_s28, %s2223_s10 }
 0x516   : > { %p1704_p6 = scmp.lt.u32.totalorder %s1702_s30, %s1698_s22  ;;  %p1706_p9 = scmp.lt.u32.totalorder %s1698_s22, %s2151_s28 }
 0x517   : > { %p1700_p2 = pnand %p1699_p1, %p1923_p5 }
 0x518   : > { %p1705_p8 = por %p1704_p6, %p1703_p4 }
 0x519   : > { %p1701_p3 = pneg %p1700_p2 }
 0x51a   : > { %p1707_p10 = por %p1706_p9, %p1705_p8 }
 0x51c   : > { %p1708_p11 = pnand %p1707_p10, %p1701_p3 }
 0x51e   : > { %1711 = shalt.err (!%p1708_p11)
}
 0x51f   : > { %s1801_s19 = smov 128   ;;  %s1802_s21 = smov 512  }
 0x520   : > { %s1803_s26 = smov 8  }
 0x521   : > { %1575 = dma.vmem_to_hbm [thread:$0]  (%p1923_p5), %s2146_s15, 512, %s2151_s28, %s2155_s23, %s1801_s19, %s1802_s21, %s1803_s26  }
 0x522 PF: > { %s2250_s11 = sld [smem:[#allocation13_spill]]  ;;  %s2251_s12 = sld [smem:[#allocation8_spill]] }
 0x528   : > { %p1581_p12 = scmp.ge.s32.totalorder %s2250_s11, 2  ;;  %s1289_s16 = sand.u32 1, %s2251_s12  }
 0x529   : > { %s1290_s17 = scalar_lea.sflag [#allocation6], %s1289_s16 }
 0x52a   : > { %p1578_p13 = pnand %p1581_p12, %p1932_p7 }
 0x52c   : > { %1753 = dma.done.wait (!%p1578_p13), %s1290_s17, 512  }
 0x52d   : > { %1755 = vsyncadd (!%p1578_p13), %s1290_s17, 4294966784  ;;  %s23_s22 = sadd.s32 1, %s2250_s11   ;;  %s2253_s18 = sld [smem:[#allocation9_spill]] }
 0x52e   : > { %p20_p0 = scmp.ge.s32.totalorder %s23_s22, 18   ;;  %s2254_s15 = sld [smem:[#allocation18_spill]] }
 0x52f   : > { %s2255_s16 = sld [smem:[#allocation10_spill]]  ;;  %s2256_s17 = sld [smem:[#allocation11_spill]] }
 0x530   : > { %s2257_s29 = sld [smem:[#allocation12_spill]]  ;;  %s2258_s19 = sld [smem:[#allocation14_spill]] }
 0x531   : > { %s2259_s20 = sld [smem:[#allocation15_spill]]  ;;  %s2260_s21 = sld [smem:[#allocation17_spill]] }
 0x532   : > { %s2261_s13 = smov %s1762_s14  ;;  %22 = sbr.rel (!%p20_p0) target bundleno = 6 (0x6), region = 117 }
 0x533   : > { %s2262_s14 = smov %s2253_s18 }
 0x536   : > { %s2263_s18 = smov %s2257_s29 }
 0x539   :  { %1295 = vsyncpa [#allocation6], 1 }
 0x53a   :  { %1297 = vsyncpa [#allocation6 + $0x1], 1 }

</bundles_post_ra>
